<compile_context>
chip_gen: v7x
topology: tpu7x:2x2x1
jax: 0.10.0
libtpu: 0.0.40
codegen_flags: <defaults>
</compile_context>

<pallas_src>
import math
import functools

import jax
import jax.numpy as jnp
from jax import lax
from jax.experimental import pallas as pl
from jax.experimental.pallas import tpu as pltpu

_VMEM_LIMIT = 32 * 1024 * 1024  # safe on v5e/v6e (128 MiB) and v7x (64 MiB)


# --------------------------- fused MHA kernel --------------------------------
def _fused_mha_kernel(q_ref, k_ref, v_ref,
                      wq_ref, bq_ref, wk_ref, bk_ref, wv_ref, bv_ref,
                      wo_ref, bo_ref, o_ref, *, h, S, D):
    # q/k/v_ref: (1, S, D) f32   inputs for this batch element
    # w{q,k,v}_ref: (h, D, d_k) bf16  per-head projection weights (scale folded
    #                                 into wq/bq), b{q,k,v}_ref: (h, 1, d_k) f32
    # wo_ref: (h, d_k, D) bf16   per-head rows of Wo^T,  bo_ref: (1, D) f32
    # o_ref: (1, S, D) f32
    bf16 = jnp.bfloat16

    def bmm(a, b, dims):
        return lax.dot_general(a, b, dims, preferred_element_type=jnp.float32)

    def project(x_ref, w_ref, b_ref):
        # (S, D) -> broadcast to (h, S, D) -> batched matmul over heads.
        x = jnp.broadcast_to(x_ref[0].astype(bf16)[None], (h, S, D))
        y = bmm(x, w_ref[...], (((2,), (1,)), ((0,), (0,))))   # (h, S, d_k) f32
        return y + b_ref[...]

    q = project(q_ref, wq_ref, bq_ref).astype(bf16)  # 1/sqrt(d_k) pre-folded
    k = project(k_ref, wk_ref, bk_ref).astype(bf16)
    v = project(v_ref, wv_ref, bv_ref).astype(bf16)

    # All heads at once: 'hqd,hkd->hqk'
    s = bmm(q, k, (((2,), (2,)), ((0,), (0,))))                # (h, S, S) f32
    m = jnp.max(s, axis=-1, keepdims=True)
    p = jnp.exp(s - m)
    denom = jnp.sum(p, axis=-1, keepdims=True)
    p = (p * pl.reciprocal(denom, approx=True)).astype(bf16)   # softmax
    # TODO(synk): dropout(p=0.1) on p_attn -> eval-mode identity here.

    ctx = bmm(p, v, (((2,), (1,)), ((0,), (0,))))              # (h, S, d_k) f32

    # Output projection with the head-merge folded into the contraction:
    #   out = sum_h ctx[h] @ Wo^T[h*d_k:(h+1)*d_k, :]  (no minor-dim reshape)
    out_h = bmm(ctx.astype(bf16), wo_ref[...],
                (((2,), (1,)), ((0,), (0,))))                  # (h, S, D) f32
    out = jnp.sum(out_h, axis=0) + bo_ref[...]                 # (S, D) f32
    o_ref[0] = out.astype(o_ref.dtype)


# ------------------------ MultiHeadedAttention fwd ---------------------------
def multi_headed_attention(query, key, value, params, h):
    """Mirrors MultiHeadedAttention.forward (eval mode).

    query/key/value: (B, S, d_model) float32
    params: dict with Wq,bq,Wk,bk,Wv,bv,Wo,bo; W* stored PyTorch-style (out, in).
    """
    B, S, D = query.shape
    d_k = D // h
    scale = 1.0 / math.sqrt(d_k)

    # Host-side weight prep: per-head layout so the kernel never reshapes the
    # lane (feature) dimension.  Scale folded into Q (exact, free).
    def per_head_w(W):  # W: (out, in) -> W.T: (in, out) -> (h, in, d_k)
        return jnp.transpose(W.T.reshape(D, h, d_k), (1, 0, 2))

    wq = (per_head_w(params["Wq"]) * scale).astype(jnp.bfloat16)
    bq = (params["bq"] * scale).reshape(h, 1, d_k).astype(jnp.float32)
    wk = per_head_w(params["Wk"]).astype(jnp.bfloat16)
    bk = params["bk"].reshape(h, 1, d_k).astype(jnp.float32)
    wv = per_head_w(params["Wv"]).astype(jnp.bfloat16)
    bv = params["bv"].reshape(h, 1, d_k).astype(jnp.float32)
    wo = params["Wo"].T.reshape(h, d_k, D).astype(jnp.bfloat16)
    bo = params["bo"].reshape(1, D).astype(jnp.float32)

    kernel = functools.partial(_fused_mha_kernel, h=h, S=S, D=D)

    cost = pl.CostEstimate(
        flops=B * (6 * S * D * D + 4 * h * S * S * d_k + 2 * S * D * D),
        transcendentals=B * h * S * S,
        bytes_accessed=3 * B * S * D * 4 + 4 * D * D * 2 + 4 * D * 4
        + B * S * D * 4,
    )

    batch_map = lambda b: (b, 0, 0)
    full3 = lambda b: (0, 0, 0)

    return pl.pallas_call(
        kernel,
        out_shape=jax.ShapeDtypeStruct((B, S, D), jnp.float32),
        grid=(B,),
        in_specs=[
            pl.BlockSpec((1, S, D), batch_map),      # query
            pl.BlockSpec((1, S, D), batch_map),      # key
            pl.BlockSpec((1, S, D), batch_map),      # value
            pl.BlockSpec((h, D, d_k), full3),        # Wq (per-head, scaled)
            pl.BlockSpec((h, 1, d_k), full3),        # bq (scaled)
            pl.BlockSpec((h, D, d_k), full3),        # Wk
            pl.BlockSpec((h, 1, d_k), full3),        # bk
            pl.BlockSpec((h, D, d_k), full3),        # Wv
            pl.BlockSpec((h, 1, d_k), full3),        # bv
            pl.BlockSpec((h, d_k, D), full3),        # Wo (per-head rows)
            pl.BlockSpec((1, D), lambda b: (0, 0)),  # bo
        ],
        out_specs=pl.BlockSpec((1, S, D), batch_map),
        compiler_params=pltpu.CompilerParams(
            dimension_semantics=("parallel",),       # both v7x TCs for B >= 2
            vmem_limit_bytes=_VMEM_LIMIT,
        ),
        cost_estimate=cost,
    )(query, key, value, wq, bq, wk, bk, wv, bv, wo, bo)


# ------------------------------ reference ------------------------------------
def reference_mha(query, key, value, params, h):
    B, S, d_model = query.shape
    d_k = d_model // h

    def lin(x, W, b):
        return x @ W.T + b

    def split(x):
        return x.reshape(B, S, h, d_k).transpose(0, 2, 1, 3)

    q = split(lin(query, params["Wq"], params["bq"]))
    k = split(lin(key, params["Wk"], params["bk"]))
    v = split(lin(value, params["Wv"], params["bv"]))
    scores = jnp.einsum("bhqd,bhkd->bhqk", q, k) / math.sqrt(d_k)
    p = jax.nn.softmax(scores, axis=-1)
    x = jnp.einsum("bhqk,bhkd->bhqd", p, v)
    x = x.transpose(0, 2, 1, 3).reshape(B, S, d_model)
    return lin(x, params["Wo"], params["bo"])


# --------------------------------- main ---------------------------------------
if __name__ == "__main__":
    B, S = 2, 8
    h, d_model = 4, 32  # d_k = 8

    key0 = jax.random.PRNGKey(0)
    keys = jax.random.split(key0, 16)

    bound = 1.0 / math.sqrt(d_model)  # PyTorch Linear default init range

    def make_linear(kw, kb):
        W = jax.random.uniform(kw, (d_model, d_model), jnp.float32, -bound, bound)
        b = jax.random.uniform(kb, (d_model,), jnp.float32, -bound, bound)
        return W, b

    Wq, bq = make_linear(keys[0], keys[1])
    Wk, bk = make_linear(keys[2], keys[3])
    Wv, bv = make_linear(keys[4], keys[5])
    Wo, bo = make_linear(keys[6], keys[7])
    params = dict(Wq=Wq, bq=bq, Wk=Wk, bk=bk, Wv=Wv, bv=bv, Wo=Wo, bo=bo)

    x_self = jax.random.normal(keys[8], (B, S, d_model), jnp.float32)
    q_in = jax.random.normal(keys[9], (B, S, d_model), jnp.float32)
    k_in = jax.random.normal(keys[10], (B, S, d_model), jnp.float32)
    v_in = jax.random.normal(keys[11], (B, S, d_model), jnp.float32)

    # bf16 MXU inputs -> compare against f32 reference with mixed-precision tol.
    TOL = dict(atol=5e-2, rtol=5e-2)

    # 1) Self-attention (SAINT's actual usage).
    out_self = multi_headed_attention(x_self, x_self, x_self, params, h)
    out_self = jax.block_until_ready(out_self)
    ref_self = reference_mha(x_self, x_self, x_self, params, h)
    assert out_self.shape == (B, S, d_model)
    assert jnp.allclose(out_self, ref_self, **TOL)

    # 2) Distinct q/k/v inputs (general path of the module's forward()).
    out_x = multi_headed_attention(q_in, k_in, v_in, params, h)
    out_x = jax.block_until_ready(out_x)
    ref_x = reference_mha(q_in, k_in, v_in, params, h)
    assert out_x.shape == (B, S, d_model)
    assert jnp.allclose(out_x, ref_x, **TOL)

    print("KERNEL_OK")
</pallas_src>

<mosaic_0001>
module attributes {stable_mosaic.version = 11 : i64} {
  func.func @_fused_mha_kernel(%arg0: i32, %arg1: memref<1x8x32xf32, #tpu.memory_space<vmem>>, %arg2: memref<1x8x32xf32, #tpu.memory_space<vmem>>, %arg3: memref<1x8x32xf32, #tpu.memory_space<vmem>>, %arg4: memref<4x32x8xbf16, #tpu.memory_space<vmem>>, %arg5: memref<4x1x8xf32, #tpu.memory_space<vmem>>, %arg6: memref<4x32x8xbf16, #tpu.memory_space<vmem>>, %arg7: memref<4x1x8xf32, #tpu.memory_space<vmem>>, %arg8: memref<4x32x8xbf16, #tpu.memory_space<vmem>>, %arg9: memref<4x1x8xf32, #tpu.memory_space<vmem>>, %arg10: memref<4x8x32xbf16, #tpu.memory_space<vmem>>, %arg11: memref<1x32xf32, #tpu.memory_space<vmem>>, %arg12: memref<1x8x32xf32, #tpu.memory_space<vmem>>) attributes {dimension_semantics = [#tpu.dimension_semantics<parallel>], iteration_bounds = array<i64: 2>, scalar_prefetch = 0 : i64, scratch_operands = 0 : i64, tpu.core_type = #tpu.core_type<tc>, window_params = [{transform_indices = @transform_0, window_bounds = array<i64: 1, 8, 32>}, {transform_indices = @transform_1, window_bounds = array<i64: 1, 8, 32>}, {transform_indices = @transform_2, window_bounds = array<i64: 1, 8, 32>}, {pipeline_mode = #tpu.pipeline_mode<synchronous>, transform_indices = @transform_3, window_bounds = array<i64: 4, 32, 8>}, {pipeline_mode = #tpu.pipeline_mode<synchronous>, transform_indices = @transform_4, window_bounds = array<i64: 4, 1, 8>}, {pipeline_mode = #tpu.pipeline_mode<synchronous>, transform_indices = @transform_5, window_bounds = array<i64: 4, 32, 8>}, {pipeline_mode = #tpu.pipeline_mode<synchronous>, transform_indices = @transform_6, window_bounds = array<i64: 4, 1, 8>}, {pipeline_mode = #tpu.pipeline_mode<synchronous>, transform_indices = @transform_7, window_bounds = array<i64: 4, 32, 8>}, {pipeline_mode = #tpu.pipeline_mode<synchronous>, transform_indices = @transform_8, window_bounds = array<i64: 4, 1, 8>}, {pipeline_mode = #tpu.pipeline_mode<synchronous>, transform_indices = @transform_9, window_bounds = array<i64: 4, 8, 32>}, {pipeline_mode = #tpu.pipeline_mode<synchronous>, transform_indices = @transform_10, window_bounds = array<i64: 1, 32>}, {transform_indices = @transform_11, window_bounds = array<i64: 1, 8, 32>}]} {
    %c0 = arith.constant 0 : index
    %c0_0 = arith.constant 0 : index
    %c0_1 = arith.constant 0 : index
    %0 = vector.load %arg1[%c0, %c0_0, %c0_1] : memref<1x8x32xf32, #tpu.memory_space<vmem>>, vector<1x8x32xf32>
    %1 = vector.shape_cast %0 : vector<1x8x32xf32> to vector<8x32xf32>
    %2 = arith.truncf %1 : vector<8x32xf32> to vector<8x32xbf16>
    %3 = vector.shape_cast %2 : vector<8x32xbf16> to vector<1x8x32xbf16>
    %4 = vector.shape_cast %3 : vector<1x8x32xbf16> to vector<1x8x32xbf16>
    %5 = vector.broadcast %4 : vector<1x8x32xbf16> to vector<4x8x32xbf16>
    %c0_2 = arith.constant 0 : index
    %c0_3 = arith.constant 0 : index
    %c0_4 = arith.constant 0 : index
    %6 = vector.load %arg4[%c0_2, %c0_3, %c0_4] : memref<4x32x8xbf16, #tpu.memory_space<vmem>>, vector<4x32x8xbf16>
    %cst = arith.constant dense<0.000000e+00> : vector<4x8x8xf32>
    %7 = tpu.matmul %5, %6, %cst {dimension_numbers = #tpu.dot_dimension_numbers<[2], [1], [1], [2], [0, 0, 0, 1, 1, 2], [0], [0]>} : vector<4x8x32xbf16>, vector<4x32x8xbf16>, vector<4x8x8xf32> -> vector<4x8x8xf32>
    %c0_5 = arith.constant 0 : index
    %c0_6 = arith.constant 0 : index
    %c0_7 = arith.constant 0 : index
    %8 = vector.load %arg5[%c0_5, %c0_6, %c0_7] : memref<4x1x8xf32, #tpu.memory_space<vmem>>, vector<4x1x8xf32>
    %9 = vector.broadcast %8 : vector<4x1x8xf32> to vector<4x8x8xf32>
    %10 = arith.addf %7, %9 : vector<4x8x8xf32>
    %11 = arith.truncf %10 : vector<4x8x8xf32> to vector<4x8x8xbf16>
    %c0_8 = arith.constant 0 : index
    %c0_9 = arith.constant 0 : index
    %c0_10 = arith.constant 0 : index
    %12 = vector.load %arg2[%c0_8, %c0_9, %c0_10] : memref<1x8x32xf32, #tpu.memory_space<vmem>>, vector<1x8x32xf32>
    %13 = vector.shape_cast %12 : vector<1x8x32xf32> to vector<8x32xf32>
    %14 = arith.truncf %13 : vector<8x32xf32> to vector<8x32xbf16>
    %15 = vector.shape_cast %14 : vector<8x32xbf16> to vector<1x8x32xbf16>
    %16 = vector.shape_cast %15 : vector<1x8x32xbf16> to vector<1x8x32xbf16>
    %17 = vector.broadcast %16 : vector<1x8x32xbf16> to vector<4x8x32xbf16>
    %c0_11 = arith.constant 0 : index
    %c0_12 = arith.constant 0 : index
    %c0_13 = arith.constant 0 : index
    %18 = vector.load %arg6[%c0_11, %c0_12, %c0_13] : memref<4x32x8xbf16, #tpu.memory_space<vmem>>, vector<4x32x8xbf16>
    %cst_14 = arith.constant dense<0.000000e+00> : vector<4x8x8xf32>
    %19 = tpu.matmul %17, %18, %cst_14 {dimension_numbers = #tpu.dot_dimension_numbers<[2], [1], [1], [2], [0, 0, 0, 1, 1, 2], [0], [0]>} : vector<4x8x32xbf16>, vector<4x32x8xbf16>, vector<4x8x8xf32> -> vector<4x8x8xf32>
    %c0_15 = arith.constant 0 : index
    %c0_16 = arith.constant 0 : index
    %c0_17 = arith.constant 0 : index
    %20 = vector.load %arg7[%c0_15, %c0_16, %c0_17] : memref<4x1x8xf32, #tpu.memory_space<vmem>>, vector<4x1x8xf32>
    %21 = vector.broadcast %20 : vector<4x1x8xf32> to vector<4x8x8xf32>
    %22 = arith.addf %19, %21 : vector<4x8x8xf32>
    %23 = arith.truncf %22 : vector<4x8x8xf32> to vector<4x8x8xbf16>
    %c0_18 = arith.constant 0 : index
    %c0_19 = arith.constant 0 : index
    %c0_20 = arith.constant 0 : index
    %24 = vector.load %arg3[%c0_18, %c0_19, %c0_20] : memref<1x8x32xf32, #tpu.memory_space<vmem>>, vector<1x8x32xf32>
    %25 = vector.shape_cast %24 : vector<1x8x32xf32> to vector<8x32xf32>
    %26 = arith.truncf %25 : vector<8x32xf32> to vector<8x32xbf16>
    %27 = vector.shape_cast %26 : vector<8x32xbf16> to vector<1x8x32xbf16>
    %28 = vector.shape_cast %27 : vector<1x8x32xbf16> to vector<1x8x32xbf16>
    %29 = vector.broadcast %28 : vector<1x8x32xbf16> to vector<4x8x32xbf16>
    %c0_21 = arith.constant 0 : index
    %c0_22 = arith.constant 0 : index
    %c0_23 = arith.constant 0 : index
    %30 = vector.load %arg8[%c0_21, %c0_22, %c0_23] : memref<4x32x8xbf16, #tpu.memory_space<vmem>>, vector<4x32x8xbf16>
    %cst_24 = arith.constant dense<0.000000e+00> : vector<4x8x8xf32>
    %31 = tpu.matmul %29, %30, %cst_24 {dimension_numbers = #tpu.dot_dimension_numbers<[2], [1], [1], [2], [0, 0, 0, 1, 1, 2], [0], [0]>} : vector<4x8x32xbf16>, vector<4x32x8xbf16>, vector<4x8x8xf32> -> vector<4x8x8xf32>
    %c0_25 = arith.constant 0 : index
    %c0_26 = arith.constant 0 : index
    %c0_27 = arith.constant 0 : index
    %32 = vector.load %arg9[%c0_25, %c0_26, %c0_27] : memref<4x1x8xf32, #tpu.memory_space<vmem>>, vector<4x1x8xf32>
    %33 = vector.broadcast %32 : vector<4x1x8xf32> to vector<4x8x8xf32>
    %34 = arith.addf %31, %33 : vector<4x8x8xf32>
    %35 = arith.truncf %34 : vector<4x8x8xf32> to vector<4x8x8xbf16>
    %cst_28 = arith.constant dense<0.000000e+00> : vector<4x8x8xf32>
    %36 = tpu.matmul %11, %23, %cst_28 {dimension_numbers = #tpu.dot_dimension_numbers<[2], [2], [1], [1], [0, 0, 0, 1, 1, 1], [0], [0]>} : vector<4x8x8xbf16>, vector<4x8x8xbf16>, vector<4x8x8xf32> -> vector<4x8x8xf32>
    %cst_29 = arith.constant dense<0xFF800000> : vector<4x8xf32>
    %37 = vector.multi_reduction <maximumf>, %36, %cst_29 [2] : vector<4x8x8xf32> to vector<4x8xf32>
    %38 = vector.shape_cast %37 : vector<4x8xf32> to vector<4x8x1xf32>
    %39 = vector.broadcast %38 : vector<4x8x1xf32> to vector<4x8x8xf32>
    %40 = arith.subf %36, %39 : vector<4x8x8xf32>
    %41 = math.exp %40 : vector<4x8x8xf32>
    %cst_30 = arith.constant dense<0.000000e+00> : vector<4x8xf32>
    %42 = vector.multi_reduction <add>, %41, %cst_30 [2] : vector<4x8x8xf32> to vector<4x8xf32>
    %43 = vector.shape_cast %42 : vector<4x8xf32> to vector<4x8x1xf32>
    %44 = tpu.reciprocal %43 {approx = true} : vector<4x8x1xf32> -> vector<4x8x1xf32>
    %45 = vector.broadcast %44 : vector<4x8x1xf32> to vector<4x8x8xf32>
    %46 = arith.mulf %41, %45 : vector<4x8x8xf32>
    %47 = arith.truncf %46 : vector<4x8x8xf32> to vector<4x8x8xbf16>
    %cst_31 = arith.constant dense<0.000000e+00> : vector<4x8x8xf32>
    %48 = tpu.matmul %47, %35, %cst_31 {dimension_numbers = #tpu.dot_dimension_numbers<[2], [1], [1], [2], [0, 0, 0, 1, 1, 2], [0], [0]>} : vector<4x8x8xbf16>, vector<4x8x8xbf16>, vector<4x8x8xf32> -> vector<4x8x8xf32>
    %49 = arith.truncf %48 : vector<4x8x8xf32> to vector<4x8x8xbf16>
    %c0_32 = arith.constant 0 : index
    %c0_33 = arith.constant 0 : index
    %c0_34 = arith.constant 0 : index
    %50 = vector.load %arg10[%c0_32, %c0_33, %c0_34] : memref<4x8x32xbf16, #tpu.memory_space<vmem>>, vector<4x8x32xbf16>
    %cst_35 = arith.constant dense<0.000000e+00> : vector<4x8x32xf32>
    %51 = tpu.matmul %49, %50, %cst_35 {dimension_numbers = #tpu.dot_dimension_numbers<[2], [1], [1], [2], [0, 0, 0, 1, 1, 2], [0], [0]>} : vector<4x8x8xbf16>, vector<4x8x32xbf16>, vector<4x8x32xf32> -> vector<4x8x32xf32>
    %cst_36 = arith.constant dense<0.000000e+00> : vector<8x32xf32>
    %52 = vector.multi_reduction <add>, %51, %cst_36 [0] : vector<4x8x32xf32> to vector<8x32xf32>
    %c0_37 = arith.constant 0 : index
    %c0_38 = arith.constant 0 : index
    %53 = vector.load %arg11[%c0_37, %c0_38] : memref<1x32xf32, #tpu.memory_space<vmem>>, vector<1x32xf32>
    %54 = vector.broadcast %53 : vector<1x32xf32> to vector<8x32xf32>
    %55 = arith.addf %52, %54 : vector<8x32xf32>
    %c0_39 = arith.constant 0 : index
    %c0_40 = arith.constant 0 : index
    %c0_41 = arith.constant 0 : index
    %56 = vector.load %arg12[%c0_39, %c0_40, %c0_41] : memref<1x8x32xf32, #tpu.memory_space<vmem>>, vector<1x8x32xf32>
    %57 = vector.shape_cast %56 : vector<1x8x32xf32> to vector<8x32xf32>
    %58 = vector.shape_cast %55 : vector<8x32xf32> to vector<1x8x32xf32>
    tpu.vector_store %arg12[%c0_39, %c0_40, %c0_41], %58 {strides = array<i32>} : memref<1x8x32xf32, #tpu.memory_space<vmem>>, vector<1x8x32xf32>,
    return
  }
  func.func @transform_0(%arg0: i32) -> (i32, i32, i32) {
    %c0_i32 = arith.constant 0 : i32
    %c0_i32_0 = arith.constant 0 : i32
    %c0_i32_1 = arith.constant 0 : i32
    return %arg0, %c0_i32, %c0_i32_0 : i32, i32, i32
  }
  func.func @transform_1(%arg0: i32) -> (i32, i32, i32) {
    %c0_i32 = arith.constant 0 : i32
    %c0_i32_0 = arith.constant 0 : i32
    %c0_i32_1 = arith.constant 0 : i32
    return %arg0, %c0_i32, %c0_i32_0 : i32, i32, i32
  }
  func.func @transform_2(%arg0: i32) -> (i32, i32, i32) {
    %c0_i32 = arith.constant 0 : i32
    %c0_i32_0 = arith.constant 0 : i32
    %c0_i32_1 = arith.constant 0 : i32
    return %arg0, %c0_i32, %c0_i32_0 : i32, i32, i32
  }
  func.func @transform_3(%arg0: i32) -> (i32, i32, i32) {
    %c0_i32 = arith.constant 0 : i32
    %c0_i32_0 = arith.constant 0 : i32
    %c0_i32_1 = arith.constant 0 : i32
    %c0_i32_2 = arith.constant 0 : i32
    return %c0_i32, %c0_i32_0, %c0_i32_1 : i32, i32, i32
  }
  func.func @transform_4(%arg0: i32) -> (i32, i32, i32) {
    %c0_i32 = arith.constant 0 : i32
    %c0_i32_0 = arith.constant 0 : i32
    %c0_i32_1 = arith.constant 0 : i32
    %c0_i32_2 = arith.constant 0 : i32
    return %c0_i32, %c0_i32_0, %c0_i32_1 : i32, i32, i32
  }
  func.func @transform_5(%arg0: i32) -> (i32, i32, i32) {
    %c0_i32 = arith.constant 0 : i32
    %c0_i32_0 = arith.constant 0 : i32
    %c0_i32_1 = arith.constant 0 : i32
    %c0_i32_2 = arith.constant 0 : i32
    return %c0_i32, %c0_i32_0, %c0_i32_1 : i32, i32, i32
  }
  func.func @transform_6(%arg0: i32) -> (i32, i32, i32) {
    %c0_i32 = arith.constant 0 : i32
    %c0_i32_0 = arith.constant 0 : i32
    %c0_i32_1 = arith.constant 0 : i32
    %c0_i32_2 = arith.constant 0 : i32
    return %c0_i32, %c0_i32_0, %c0_i32_1 : i32, i32, i32
  }
  func.func @transform_7(%arg0: i32) -> (i32, i32, i32) {
    %c0_i32 = arith.constant 0 : i32
    %c0_i32_0 = arith.constant 0 : i32
    %c0_i32_1 = arith.constant 0 : i32
    %c0_i32_2 = arith.constant 0 : i32
    return %c0_i32, %c0_i32_0, %c0_i32_1 : i32, i32, i32
  }
  func.func @transform_8(%arg0: i32) -> (i32, i32, i32) {
    %c0_i32 = arith.constant 0 : i32
    %c0_i32_0 = arith.constant 0 : i32
    %c0_i32_1 = arith.constant 0 : i32
    %c0_i32_2 = arith.constant 0 : i32
    return %c0_i32, %c0_i32_0, %c0_i32_1 : i32, i32, i32
  }
  func.func @transform_9(%arg0: i32) -> (i32, i32, i32) {
    %c0_i32 = arith.constant 0 : i32
    %c0_i32_0 = arith.constant 0 : i32
    %c0_i32_1 = arith.constant 0 : i32
    %c0_i32_2 = arith.constant 0 : i32
    return %c0_i32, %c0_i32_0, %c0_i32_1 : i32, i32, i32
  }
  func.func @transform_10(%arg0: i32) -> (i32, i32) {
    %c0_i32 = arith.constant 0 : i32
    %c0_i32_0 = arith.constant 0 : i32
    %c0_i32_1 = arith.constant 0 : i32
    return %c0_i32, %c0_i32_0 : i32, i32
  }
  func.func @transform_11(%arg0: i32) -> (i32, i32, i32) {
    %c0_i32 = arith.constant 0 : i32
    %c0_i32_0 = arith.constant 0 : i32
    %c0_i32_1 = arith.constant 0 : i32
    return %arg0, %c0_i32, %c0_i32_0 : i32, i32, i32
  }
}

</mosaic_0001>

<bundles_post_ra>
// kernel: tpu_custom_call.1
= control target key start
LH: loop header
LB: loop body
LE: loop exit
PB: predicated region body
PF: predicated region fallthrough
CT: control target
= control target key end

     0   :  { %s2806_s0 = inlined_call_operand.vmem [shape: f32[2,8,32], index: 0, kind: input, shape index: {}]   ;;  %s2807_s1 = inlined_call_operand.vmem [shape: f32[2,8,32], index: 1, kind: input, shape index: {}]   ;;  %s2808_s2 = inlined_call_operand.vmem [shape: f32[2,8,32], index: 2, kind: input, shape index: {}]   ;;  %s2809_s3 = inlined_call_operand.vmem [shape: bf16[4,32,8], index: 3, kind: input, shape index: {}]   ;;  %s2810_s4 = inlined_call_operand.vmem [shape: f32[4,1,8], index: 4, kind: input, shape index: {}]   ;;  %s2811_s5 = inlined_call_operand.vmem [shape: bf16[4,32,8], index: 5, kind: input, shape index: {}]   ;;  %s2812_s6 = inlined_call_operand.vmem [shape: f32[4,1,8], index: 6, kind: input, shape index: {}]   ;;  %s2813_s7 = inlined_call_operand.vmem [shape: bf16[4,32,8], index: 7, kind: input, shape index: {}]   ;;  %s2814_s8 = inlined_call_operand.vmem [shape: f32[4,1,8], index: 8, kind: input, shape index: {}]   ;;  %s2815_s9 = inlined_call_operand.vmem [shape: bf16[4,8,32], index: 9, kind: input, shape index: {}]   ;;  %s2816_s10 = inlined_call_operand.vmem [shape: f32[1,32], index: 10, kind: input, shape index: {}]   ;;  %s2817_s11 = inlined_call_operand.hbm [shape: f32[2,8,32], index: 11, kind: output, shape index: {}]  }
   0x1   :  { %2818 = sst [smem:[#allocation5_spill]] %s2806_s0 }
   0x2   :  { %16 = vsyncpa [#allocation3], 0 }
   0x3   :  { %18 = vsyncpa [#allocation3 + $0x1], 0  ;;  %s2433_s17 = smov 0   ;;  %s2435_s18 = smov 0  }
   0x4   :  { %s2437_s19 = smov 0   ;;  %s2439_s20 = smov 0  }
   0x5 LB: > { %s2454_s21 = sadd.s32 4294967295, %s2368_s20   ;;  %s1924_s22 = sadd.s32 4294967294, %s2368_s20   ;;  %s2368_s20 = sphi %s2439_s20, %s2825_s20   ;;  %s2364_s19 = sphi %s2437_s19, %s2824_s19   ;;  %s2360_s18 = sphi %s2435_s18, %s2823_s18   ;;  %s2356_s17 = sphi %s2433_s17, %s2822_s17  }
   0x6   : > { %s2458_s23 = sadd.s32 1, %s2368_s20   ;;  %s277_s24 = sadd.s32 1, %s2364_s19 }
   0x7   : > { %s274_s25 = ssub.s32 %s2368_s20, %s2458_s23  ;;  %p287_p0 = scmp.ne.s32.totalorder %s2364_s19, %s2360_s18 }
   0x8   : > { %p275_p1 = scmp.eq.s32.totalorder %s274_s25, 0  ;;  %p288_p2 = scmp.eq.s32.totalorder %s2454_s21, 1 }
   0x9   : > { %p293_p3 = scmp.ne.s32.totalorder %s2360_s18, %s2356_s17  ;;  %p294_p4 = scmp.eq.s32.totalorder %s1924_s22, 1 }
   0xa   : > { %s2469_s26 = scalar_select %p275_p1, %s2364_s19, %s277_s24  }
   0xb   : > { %p2471_p5 = por %p288_p2, %p287_p0  ;;  %p2475_p6 = por %p294_p4, %p293_p3 }
   0xc   : > { %p1927_p7 = scmp.ge.s32.totalorder %s2368_s20, 1  ;;  %p357_p8 = scmp.lt.s32.totalorder %s2368_s20, 3 }
   0xe   : > { %p358_p9 = pnand %p1927_p7, %p357_p8 }
   0xf   : > { %v2266_v0 = vld [vmem:[%s2809_s3] sm:$0xff] (!%p358_p9)   ;;  %v2370_v1 = vmov (!%p358_p9), 0.0   ;;  %v2267_v2 = vld [vmem:[%s2809_s3 + $0x10] sm:$0xff] (!%p358_p9)   ;;  %v2268_v3 = vld [vmem:[%s2809_s3 + $0x8] sm:$0xff] (!%p358_p9)   ;;  %vm2371_vm0 = vmmov (!%p358_p9), 0   ;;  %p404_p10 = scmp.lt.s32.totalorder (!%p358_p9), %s2454_s21, 1 }
  0x10   : > { %361 = sbr.rel (%p358_p9) target bundleno = 1255 (0x4e7), region = 64  ;;  %2057 = vmatprep.subr.bf16.mxu0 (!%p358_p9), %v2370_v1  ;;  %2065 = vmatprep.subr.bf16.mxu1 (!%p358_p9), %v2370_v1  ;;  %v2269_v4 = vld [vmem:[%s2809_s3 + $0x18] sm:$0xff] (!%p358_p9)   ;;  %v2270_v5 = vld [vmem:[%s2809_s3 + $0x20] sm:$0xff] (!%p358_p9)   ;;  %s2821_s0 = sld [smem:[#allocation5_spill]] (!%p358_p9)  ;;  %v2271_v6 = vld [vmem:[%s2809_s3 + $0x30] sm:$0xff] (!%p358_p9)   ;;  %vm475_vm1 = vcmask (!%p358_p9), 261120  }
  0x11   : > { %2058 = vmatpush3.bf16.msra.mxu0 (!%p358_p9), %v2266_v0  ;;  %2061 = vmatprep.mubr.msk.bf16.mxu0 (!%p358_p9), %vm2371_vm0, %v2370_v1  ;;  %v2272_v9 = vld [vmem:[%s2809_s3 + $0x28] sm:$0xff] (!%p358_p9)   ;;  %v2273_v10 = vld [vmem:[%s2809_s3 + $0x38] sm:$0xff] (!%p358_p9)   ;;  %v2274_v11 = vld [vmem:[%s2811_s5] sm:$0xff] (!%p358_p9)   ;;  %vm1201_vm2 = vcmask (!%p358_p9), 64512   ;;  %vm1437_vm3 = vcmask (!%p358_p9), 1043456   ;;  %s401_s15 = sand.u32 (!%p358_p9), 1, %s2360_s18  }
  0x12   : > { %2066 = vmatpush3.bf16.msra.mxu1 (!%p358_p9), %v2267_v2  ;;  %2059 = vmatprep.subr.bf16.mxu0 (!%p358_p9), %v2370_v1  ;;  %v2275_v12 = vld [vmem:[%s2811_s5 + $0x10] sm:$0xff] (!%p358_p9)   ;;  %v2276_v13 = vld [vmem:[%s2811_s5 + $0x8] sm:$0xff] (!%p358_p9)   ;;  %v2277_v14 = vld [vmem:[%s2811_s5 + $0x18] sm:$0xff] (!%p358_p9)   ;;  %s1828_s22 = scalar_lea.sflag (!%p358_p9), [#allocation3], %s401_s15 }
  0x13   : > { %2067 = vmatprep.subr.bf16.mxu1 (!%p358_p9), %v2370_v1  ;;  %2069 = vmatprep.mubr.msk.bf16.mxu1 (!%p358_p9), %vm2371_vm0, %v2370_v1  ;;  %v2278_v17 = vld [vmem:[%s2811_s5 + $0x20] sm:$0xff] (!%p358_p9)   ;;  %v2279_v18 = vld [vmem:[%s2811_s5 + $0x30] sm:$0xff] (!%p358_p9)   ;;  %v2280_v19 = vld [vmem:[%s2811_s5 + $0x28] sm:$0xff] (!%p358_p9)  }
  0x14   : > { %v2281_v20 = vld [vmem:[%s2811_s5 + $0x38] sm:$0xff] (!%p358_p9)   ;;  %v2282_v21 = vld [vmem:[%s2813_s7] sm:$0xff] (!%p358_p9)   ;;  %v2283_v22 = vld [vmem:[%s2813_s7 + $0x10] sm:$0xff] (!%p358_p9)  }
  0x15   : > { %2060 = vmatpush3.bf16.msra.mxu0 (!%p358_p9), %v2268_v3  ;;  %v2284_v23 = vld [vmem:[%s2813_s7 + $0x8] sm:$0xff] (!%p358_p9)   ;;  %v2285_v24 = vld [vmem:[%s2813_s7 + $0x18] sm:$0xff] (!%p358_p9)   ;;  %v2286_v27 = vld [vmem:[%s2813_s7 + $0x20] sm:$0xff] (!%p358_p9)  }
  0x16   : > { %2068 = vmatpush3.bf16.msra.mxu1 (!%p358_p9), %v2269_v4  ;;  %2073 = vmatprep.subr.bf16.mxu0 (!%p358_p9), %v2370_v1  ;;  %v2287_v28 = vld [vmem:[%s2813_s7 + $0x30] sm:$0xff] (!%p358_p9)   ;;  %v2288_v29 = vld [vmem:[%s2813_s7 + $0x28] sm:$0xff] (!%p358_p9)   ;;  %v2289_v30 = vld [vmem:[%s2813_s7 + $0x38] sm:$0xff] (!%p358_p9)  }
  0x17   : > { %s405_s24 = scalar_select %p404_p10, %s2454_s21, 1  ;;  %2081 = vmatprep.subr.bf16.mxu1 %v2370_v1  ;;  %v1948_v47 = vld [vmem:[%s2812_s6] ss:$0 sm:$0xff]  ;;  %v1949_v48 = vld [vmem:[%s2812_s6 + $0x1] ss:$0 sm:$0xff] }
  0x18   : > { %v1932_v61 = vld [vmem:[%s2810_s4] ss:$0 sm:$0xff]  ;;  %v1933_v62 = vld [vmem:[%s2810_s4 + $0x1] ss:$0 sm:$0xff]  ;;  %v1950_v2 = vld [vmem:[%s2812_s6 + $0x2] ss:$0 sm:$0xff] }
  0x19   : > { %s2503_s25 = sshll.u32 %s405_s24, 3  ;;  %v1951_v3 = vld [vmem:[%s2812_s6 + $0x3] ss:$0 sm:$0xff]  ;;  %s1994_s24 = sshll.u32 %s2454_s21, 7 }
  0x1a   : > { %s407_s14 = scalar_lea.vmem %s2821_s0, %s2503_s25  ;;  %s411_s16 = scalar_lea.vmem %s2807_s1, %s2503_s25 }
  0x1b   : > { %v417_v7 = vld [vmem:[%s407_s14] sm:$0xff]  ;;  %s415_s12 = scalar_lea.vmem %s2808_s2, %s2503_s25  ;;  %s2763_s14 = scalar_lea.hbm %s2817_s11, %s1994_s24 }
  0x1c   : > { %v418_v8 = vpack.c.bf16 %v417_v7, %v417_v7  ;;  %v679_v15 = vld [vmem:[%s411_s16] sm:$0xff]  ;;  %s1928_s16 = sshll.u32 %s401_s15, 3 }
  0x1d   : > { %v680_v16 = vpack.c.bf16 %v679_v15, %v679_v15  ;;  %v940_v25 = vld [vmem:[%s415_s12] sm:$0xff]  ;;  %s403_s29 = scalar_lea.vmem [#allocation2], %s1928_s16  ;;  %s2372_s16 = smov [#allocation2]  }
  0x1e   : > { %2062 = vmatmul.mubr.msk.bf16.vlgmr.msra.gmra.mrb[0].mxu0 %vm475_vm1, %v418_v8  ;;  %2070 = vmatmul.mubr.msk.bf16.vlgmr.msra.gmra.mrb[0].mxu1 %vm475_vm1, %v418_v8  ;;  %v941_v26 = vpack.c.bf16 %v940_v25, %v940_v25  ;;  %s1841_s30 = sshll.u32 %s403_s29, 4  ;;  %s2310_s25 = sshll.u32 %s2372_s16, 4  ;;  %s2765_s30 = int_to_ptr.vmem [resolvable:$true] %s1841_s30  ;;  %s2311_s25 = int_to_ptr.vmem [resolvable:$false] %s2310_s25 }
  0x1f   : > { %2074 = vmatpush3.bf16.msra.mxu0 %v2270_v5  ;;  %2082 = vmatpush3.bf16.msra.mxu1 %v2271_v6  ;;  %s2306_s21 = scalar_lea.vmem %s2765_s30, 128  ;;  %s2312_s0 = scalar_lea.vmem %s2311_s25, 256 }
  0x20   : > { %2075 = vmatprep.subr.bf16.mxu0 %v2370_v1  ;;  %2083 = vmatprep.subr.bf16.mxu1 %v2370_v1  ;;  %p2307_p11 = scmp.ne.s32.totalorder %s2765_s30, %s2306_s21  ;;  %p2313_p0 = scmp.lt.s32.totalorder %s2765_s30, %s2311_s25 }
  0x21   : > { %2077 = vmatprep.mubr.msk.bf16.mxu0 %vm2371_vm0, %v2370_v1  ;;  %2085 = vmatprep.mubr.msk.bf16.mxu1 %vm2371_vm0, %v2370_v1  ;;  %p2314_p1 = scmp.lt.s32.totalorder %s2312_s0, %s2306_s21 }
  0x22   : > { %p2308_p12 = pnand %p2307_p11, %p2471_p5 }
  0x23   : > { %2076 = vmatpush3.bf16.msra.mxu0 %v2272_v9  ;;  %2084 = vmatpush3.bf16.msra.mxu1 %v2273_v10  ;;  %p2315_p2 = por %p2314_p1, %p2313_p0 }
  0x24   : > { %2089 = vmatprep.subr.bf16.mxu0 %v2370_v1  ;;  %2097 = vmatprep.subr.bf16.mxu1 %v2370_v1  ;;  %p2309_p13 = pneg %p2308_p12 }
  0x26   : > { %2078 = vmatmul.mubr.msk.bf16.vlgmr.msra.gmra.mrb[4].mxu0 %vm475_vm1, %v418_v8  ;;  %2086 = vmatmul.mubr.msk.bf16.vlgmr.msra.gmra.mrb[4].mxu1 %vm475_vm1, %v418_v8  ;;  %p2316_p3 = pnand %p2315_p2, %p2309_p13 }
  0x27   : > { %2090 = vmatpush3.bf16.msra.mxu0 %v2274_v11  ;;  %2098 = vmatpush3.bf16.msra.mxu1 %v2275_v12 }
  0x28   : > { %2091 = vmatprep.subr.bf16.mxu0 %v2370_v1  ;;  %2099 = vmatprep.subr.bf16.mxu1 %v2370_v1 }
  0x29   : > { %2093 = vmatprep.mubr.msk.bf16.mxu0 %vm2371_vm0, %v2370_v1  ;;  %2101 = vmatprep.mubr.msk.bf16.mxu1 %vm2371_vm0, %v2370_v1 }
  0x2b   : > { %2092 = vmatpush3.bf16.msra.mxu0 %v2276_v13  ;;  %2100 = vmatpush3.bf16.msra.mxu1 %v2277_v14 }
  0x2c   : > { %2105 = vmatprep.subr.bf16.mxu0 %v2370_v1  ;;  %2113 = vmatprep.subr.bf16.mxu1 %v2370_v1 }
  0x2e   : > { %2094 = vmatmul.mubr.msk.bf16.vlgmr.msra.gmra.mrb[8].mxu0 %vm475_vm1, %v680_v16  ;;  %2102 = vmatmul.mubr.msk.bf16.vlgmr.msra.gmra.mrb[8].mxu1 %vm475_vm1, %v680_v16 }
  0x2f   : > { %2106 = vmatpush3.bf16.msra.mxu0 %v2278_v17  ;;  %2114 = vmatpush3.bf16.msra.mxu1 %v2279_v18 }
  0x30   : > { %2107 = vmatprep.subr.bf16.mxu0 %v2370_v1  ;;  %2115 = vmatprep.subr.bf16.mxu1 %v2370_v1 }
  0x31   : > { %2109 = vmatprep.mubr.msk.bf16.mxu0 %vm2371_vm0, %v2370_v1  ;;  %2117 = vmatprep.mubr.msk.bf16.mxu1 %vm2371_vm0, %v2370_v1 }
  0x33   : > { %2108 = vmatpush3.bf16.msra.mxu0 %v2280_v19  ;;  %2116 = vmatpush3.bf16.msra.mxu1 %v2281_v20  ;;  %v1934_v20 = vld [vmem:[%s2810_s4 + $0x2] ss:$0 sm:$0xff] }
  0x34   : > { %2121 = vmatprep.subr.bf16.mxu0 %v2370_v1  ;;  %2129 = vmatprep.subr.bf16.mxu1 %v2370_v1 }
  0x36   : > { %2110 = vmatmul.mubr.msk.bf16.vlgmr.msra.gmra.mrb[12].mxu0 %vm475_vm1, %v680_v16  ;;  %2118 = vmatmul.mubr.msk.bf16.vlgmr.msra.gmra.mrb[12].mxu1 %vm475_vm1, %v680_v16 }
  0x37   : > { %2122 = vmatpush3.bf16.msra.mxu0 %v2282_v21  ;;  %2125 = vmatprep.mubr.msk.bf16.mxu0 %vm2371_vm0, %v2370_v1  ;;  %v1935_v21 = vld [vmem:[%s2810_s4 + $0x3] ss:$0 sm:$0xff] }
  0x38   : > { %2123 = vmatprep.subr.bf16.mxu0 %v2370_v1  ;;  %2133 = vmatprep.mubr.msk.bf16.mxu1 %vm2371_vm0, %v2370_v1 }
  0x39   : > { %2130 = vmatpush3.bf16.msra.mxu1 %v2283_v22 }
  0x3a   : > { %2131 = vmatprep.subr.bf16.mxu1 %v2370_v1 }
  0x3b   : > { %2124 = vmatpush3.bf16.msra.mxu0 %v2284_v23 }
  0x3c   : > { %2137 = vmatprep.subr.bf16.mxu0 %v2370_v1 }
  0x3d   : > { %2132 = vmatpush3.bf16.msra.mxu1 %v2285_v24 }
  0x3e   : > { %2126 = vmatmul.mubr.msk.bf16.vlgmr.msra.gmra.mrb[16].mxu0 %vm475_vm1, %v941_v26  ;;  %2145 = vmatprep.subr.bf16.mxu1 %v2370_v1 }
  0x3f   : > { %2141 = vmatprep.mubr.msk.bf16.mxu0 %vm2371_vm0, %v2370_v1  ;;  %2138 = vmatpush3.bf16.msra.mxu0 %v2286_v27 }
  0x40   : > { %2134 = vmatmul.mubr.msk.bf16.vlgmr.msra.gmra.mrb[16].mxu1 %vm475_vm1, %v941_v26  ;;  %2139 = vmatprep.subr.bf16.mxu0 %v2370_v1 }
  0x41   : > { %2146 = vmatpush3.bf16.msra.mxu1 %v2287_v28  ;;  %2149 = vmatprep.mubr.msk.bf16.mxu1 %vm2371_vm0, %v2370_v1  ;;  %v1964_v28 = vld [vmem:[%s2814_s8] ss:$0 sm:$0xff] }
  0x42   : > { %2147 = vmatprep.subr.bf16.mxu1 %v2370_v1 }
  0x43   : > { %2140 = vmatpush3.bf16.msra.mxu0 %v2288_v29 }
  0x44   : > { %2153 = vmatprep.subr.bf16.mxu0 %v2370_v1 }
  0x45   : > { %2148 = vmatpush3.bf16.msra.mxu1 %v2289_v30  ;;  %v1965_v30 = vld [vmem:[%s2814_s8 + $0x1] ss:$0 sm:$0xff] }
  0x46   : > { %2159 = vmatprep.subr.bf16.mxu1 %v2370_v1  ;;  %2142 = vmatmul.mubr.msk.bf16.vlgmr.msra.gmra.mrb[20].mxu0 %vm475_vm1, %v941_v26 }
  0x47   : > { %2155 = vmatprep.mubr.msk.bf16.mxu0 %vm2371_vm0, %v2370_v1 }
  0x48   : > { %2150 = vmatmul.mubr.msk.bf16.vlgmr.msra.gmra.mrb[20].mxu1 %vm475_vm1, %v941_v26 }
  0x49   : > { %2161 = vmatprep.mubr.msk.bf16.mxu1 %vm2371_vm0, %v2370_v1 }
  0xf1   : > { %v513_v31 = vpop.f32.mrb[0].mxu0  ;;  %v565_v32 = vpop.f32.mrb[0].mxu1 }
  0xf2   : > { %v2063_v33 = vpop.f32.mrb[1].mxu0  ;;  %v2071_v34 = vpop.f32.mrb[1].mxu1  ;;  %v514_v4 = vadd.f32 %v1932_v61, %v513_v31  ;;  %v566_v5 = vadd.f32 %v1933_v62, %v565_v32 }
  0xf3   : > { %v516_v35 = vpop.f32.mrb[2].mxu0  ;;  %v568_v36 = vpop.f32.mrb[2].mxu1 }
  0xf4   : > { %v2064_v37 = vpop.f32.mrb[3].mxu0  ;;  %v2072_v38 = vpop.f32.mrb[3].mxu1  ;;  %v675_v14 = vpack.c.bf16 %v514_v4, %v514_v4  ;;  %v676_v15 = vpack.c.bf16 %v566_v5, %v566_v5 }
  0xf9   : > { %v617_v39 = vpop.f32.mrb[4].mxu0  ;;  %v669_v40 = vpop.f32.mrb[4].mxu1 }
  0xfa   : > { %v2079_v41 = vpop.f32.mrb[5].mxu0  ;;  %v2087_v42 = vpop.f32.mrb[5].mxu1  ;;  %v618_v24 = vadd.f32 %v1934_v20, %v617_v39  ;;  %v670_v25 = vadd.f32 %v1935_v21, %v669_v40 }
  0xfb   : > { %v620_v43 = vpop.f32.mrb[6].mxu0  ;;  %v672_v44 = vpop.f32.mrb[6].mxu1 }
  0xfc   : > { %v2080_v45 = vpop.f32.mrb[7].mxu0  ;;  %v2088_v46 = vpop.f32.mrb[7].mxu1  ;;  %v677_v26 = vpack.c.bf16 %v618_v24, %v618_v24  ;;  %v678_v27 = vpack.c.bf16 %v670_v25, %v670_v25 }
 0x101   : > { %v774_v49 = vpop.f32.mrb[8].mxu0  ;;  %v826_v50 = vpop.f32.mrb[8].mxu1 }
 0x102   : > { %v775_v51 = vadd.f32 %v1948_v47, %v774_v49  ;;  %v827_v52 = vadd.f32 %v1949_v48, %v826_v50  ;;  %v2095_v53 = vpop.f32.mrb[9].mxu0  ;;  %v2103_v54 = vpop.f32.mrb[9].mxu1 }
 0x103   : > { %v777_v55 = vpop.f32.mrb[10].mxu0  ;;  %v829_v56 = vpop.f32.mrb[10].mxu1 }
 0x104   : > { %v936_v57 = vpack.c.bf16 %v775_v51, %v775_v51  ;;  %v937_v58 = vpack.c.bf16 %v827_v52, %v827_v52  ;;  %v2096_v59 = vpop.f32.mrb[11].mxu0  ;;  %v2104_v60 = vpop.f32.mrb[11].mxu1 }
 0x106   : > { %v1206_v63 = vsel %vm1201_vm2, %v936_v57, 0  ;;  %v1252_v0 = vsel %vm1201_vm2, %v937_v58, 0 }
 0x107   : > { %2154 = vmatpush3.bf16.xpose.msra.mxu0 %v1206_v63  ;;  %2160 = vmatpush3.bf16.xpose.msra.mxu1 %v1252_v0 }
 0x108   : > { %2165 = vmatprep.subr.bf16.mxu0 %v2370_v1  ;;  %2171 = vmatprep.subr.bf16.mxu1 %v2370_v1 }
 0x109   : > { %v878_v6 = vpop.f32.mrb[12].mxu0  ;;  %v930_v7 = vpop.f32.mrb[12].mxu1 }
 0x10a   : > { %v879_v8 = vadd.f32 %v1950_v2, %v878_v6  ;;  %v931_v9 = vadd.f32 %v1951_v3, %v930_v7  ;;  %v2111_v10 = vpop.f32.mrb[13].mxu0  ;;  %v2119_v11 = vpop.f32.mrb[13].mxu1 }
 0x10b   : > { %v881_v12 = vpop.f32.mrb[14].mxu0  ;;  %v933_v13 = vpop.f32.mrb[14].mxu1 }
 0x10c   : > { %v938_v16 = vpack.c.bf16 %v879_v8, %v879_v8  ;;  %v939_v17 = vpack.c.bf16 %v931_v9, %v931_v9  ;;  %v2112_v18 = vpop.f32.mrb[15].mxu0  ;;  %v2120_v19 = vpop.f32.mrb[15].mxu1 }
 0x10e   : > { %v1298_v22 = vsel %vm1201_vm2, %v938_v16, 0  ;;  %v1344_v23 = vsel %vm1201_vm2, %v939_v17, 0  ;;  %2156 = vmatmul.mubr.msk.bf16.vlgmr.msra.gmra.mrb[24].mxu0 %vm1201_vm2, %v675_v14  ;;  %2162 = vmatmul.mubr.msk.bf16.vlgmr.msra.gmra.mrb[24].mxu1 %vm1201_vm2, %v676_v15 }
 0x10f   : > { %2166 = vmatpush3.bf16.xpose.msra.mxu0 %v1298_v22  ;;  %2172 = vmatpush3.bf16.xpose.msra.mxu1 %v1344_v23 }
 0x110   : > { %2167 = vmatprep.mubr.msk.bf16.mxu0 %vm2371_vm0, %v2370_v1  ;;  %2173 = vmatprep.mubr.msk.bf16.mxu1 %vm2371_vm0, %v2370_v1 }
 0x111   : > { %2177 = vmatprep.subr.bf16.mxu0 %v2370_v1  ;;  %2183 = vmatprep.subr.bf16.mxu1 %v2370_v1  ;;  %v1035_v29 = vpop.f32.mrb[16].mxu0 }
 0x112   : > { %v1036_v31 = vadd.f32 %v1964_v28, %v1035_v29  ;;  %v2127_v32 = vpop.f32.mrb[17].mxu0 }
 0x113   : > { %v1038_v33 = vpop.f32.mrb[18].mxu0  ;;  %v1087_v34 = vpop.f32.mrb[16].mxu1 }
 0x114   : > { %v1197_v35 = vpack.c.bf16 %v1036_v31, %v1036_v31  ;;  %v2128_v36 = vpop.f32.mrb[19].mxu0  ;;  %v1088_v37 = vadd.f32 %v1965_v30, %v1087_v34  ;;  %v2135_v38 = vpop.f32.mrb[17].mxu1  ;;  %v1966_v31 = vld [vmem:[%s2814_s8 + $0x2] ss:$0 sm:$0xff]  ;;  %v1967_v34 = vld [vmem:[%s2814_s8 + $0x3] ss:$0 sm:$0xff] }
 0x115   : > { %v1090_v39 = vpop.f32.mrb[18].mxu1 }
 0x116   : > { %2168 = vmatmul.mubr.msk.bf16.vlgmr.msra.gmra.mrb[28].mxu0 %vm1201_vm2, %v677_v26  ;;  %2174 = vmatmul.mubr.msk.bf16.vlgmr.msra.gmra.mrb[28].mxu1 %vm1201_vm2, %v678_v27  ;;  %v1439_v40 = vsel %vm1437_vm3, %v1197_v35, 0  ;;  %v1198_v41 = vpack.c.bf16 %v1088_v37, %v1088_v37  ;;  %v2136_v42 = vpop.f32.mrb[19].mxu1 }
 0x117   : > { %2179 = vmatprep.mubr.msk.bf16.mxu0 %vm2371_vm0, %v2370_v1  ;;  %2185 = vmatprep.mubr.msk.bf16.mxu1 %vm2371_vm0, %v2370_v1 }
 0x118   : > { %2178 = vmatpush3.bf16.msra.mxu0 %v1439_v40  ;;  %v1485_v43 = vsel %vm1437_vm3, %v1198_v41, 0 }
 0x119   : > { %2189 = vmatprep.subr.bf16.mxu0 %v2370_v1  ;;  %2184 = vmatpush3.bf16.msra.mxu1 %v1485_v43  ;;  %v2689_v44 = vpop.f32.mrb[20].mxu0 }
 0x11a   : > { %2195 = vmatprep.subr.bf16.mxu1 %v2370_v1  ;;  %v2143_v46 = vpop.f32.mrb[21].mxu0  ;;  %v1140_v32 = vadd.f32 %v1966_v31, %v2689_v44 }
 0x11b   : > { %v2691_v45 = vpop.f32.mrb[20].mxu1  ;;  %v1142_v48 = vpop.f32.mrb[22].mxu0 }
 0x11c   : > { %v2151_v47 = vpop.f32.mrb[21].mxu1  ;;  %v2144_v50 = vpop.f32.mrb[23].mxu0  ;;  %v1199_v36 = vpack.c.bf16 %v1140_v32, %v1140_v32  ;;  %v1192_v37 = vadd.f32 %v1967_v34, %v2691_v45  ;;  %v1623_v45 = vld [vmem:[%s2815_s9] sm:$0xf] }
 0x11d   : > { %v1194_v49 = vpop.f32.mrb[22].mxu1 }
 0x11e   : > { %v2152_v51 = vpop.f32.mrb[23].mxu1  ;;  %v1531_v42 = vsel %vm1437_vm3, %v1199_v36, 0  ;;  %v1200_v43 = vpack.c.bf16 %v1192_v37, %v1192_v37  ;;  %v1992_v36 = vld [vmem:[%s2816_s10] ss:$0 sm:$0xff] }
 0x11f   : > { %v1631_v51 = vsel %vm1437_vm3, %v1623_v45, 0 }
 0x120   : > { %v1577_v48 = vsel %vm1437_vm3, %v1200_v43, 0 }
 0x1e1   : > { %v1242_v52 = vpop.f32.mrb[24].mxu0  ;;  %v1288_v53 = vpop.f32.mrb[24].mxu1 }
 0x1e2   : > { %v2157_v54 = vpop.f32.mrb[25].mxu0  ;;  %v2163_v55 = vpop.f32.mrb[25].mxu1  ;;  %v1386_v56 = vsel %vm1201_vm2, %v1242_v52, -inf  ;;  %v1389_v61 = vsel %vm1201_vm2, %v1288_v53, -inf }
 0x1e3   : > { %v1291_v57 = vpop.f32.mrb[26].mxu1  ;;  %1387 = vmax.xlane.f32.xlu0 %v1386_v56  ;;  %v1245_v58 = vpop.f32.mrb[26].mxu0  ;;  %v1624_v55 = vld [vmem:[%s2815_s9 + $0x4] sm:$0xf] }
 0x1e4   : > { %v2158_v59 = vpop.f32.mrb[27].mxu0  ;;  %v2164_v60 = vpop.f32.mrb[27].mxu1  ;;  %v1677_v56 = vsel %vm1437_vm3, %v1624_v55, 0  ;;  %v1625_v57 = vld [vmem:[%s2815_s9 + $0x8] sm:$0xf] }
 0x1e7   : > { %1390 = vmax.xlane.f32.xlu0 %v1389_v61  ;;  %v1723_v61 = vsel %vm1437_vm3, %v1625_v57, 0 }
 0x1e9   : > { %v1334_v62 = vpop.f32.mrb[28].mxu0  ;;  %v1380_v63 = vpop.f32.mrb[28].mxu1 }
 0x1ea   : > { %v2169_v0 = vpop.f32.mrb[29].mxu0  ;;  %v2175_v2 = vpop.f32.mrb[29].mxu1  ;;  %v1392_v3 = vsel %vm1201_vm2, %v1334_v62, -inf  ;;  %v1395_v8 = vsel %vm1201_vm2, %v1380_v63, -inf }
 0x1eb   : > { %v1383_v4 = vpop.f32.mrb[30].mxu1  ;;  %1393 = vmax.xlane.f32.xlu1 %v1392_v3  ;;  %v1337_v5 = vpop.f32.mrb[30].mxu0 }
 0x1ec   : > { %v2170_v6 = vpop.f32.mrb[31].mxu0  ;;  %v2176_v7 = vpop.f32.mrb[31].mxu1 }
 0x1ef   : > { %1396 = vmax.xlane.f32.xlu1 %v1395_v8 }
 0x270   : > { %v1388_v9 = vpop.xlane.xlu0 %1387 }
 0x271   : > { %v1398_v10 = vsub.f32 %v1242_v52, %v1388_v9 }
 0x273   : > { %v1402_v11 = vmul.f32 1.442695, %v1398_v10 }
 0x274   : > { %v1391_v12 = vpop.xlane.xlu0 %1390 }
 0x275   : > { %2290 = vpow2.f32 %v1402_v11  ;;  %v1399_v13 = vsub.f32 %v1288_v53, %v1391_v12 }
 0x277   : > { %v1404_v14 = vmul.f32 1.442695, %v1399_v13 }
 0x278   : > { %v1394_v15 = vpop.xlane.xlu1 %1393 }
 0x279   : > { %2292 = vpow2.f32 %v1404_v14  ;;  %v1400_v16 = vsub.f32 %v1334_v62, %v1394_v15 }
 0x27b   : > { %v1406_v17 = vmul.f32 1.442695, %v1400_v16 }
 0x27c   : > { %v1397_v18 = vpop.xlane.xlu1 %1396 }
 0x27d   : > { %2294 = vpow2.f32 %v1406_v17  ;;  %v1401_v19 = vsub.f32 %v1380_v63, %v1397_v18  ;;  %v1626_v63 = vld [vmem:[%s2815_s9 + $0xc] sm:$0xf] }
 0x27e   : > { %v1769_v5 = vsel %vm1437_vm3, %v1626_v63, 0 }
 0x27f   : > { %v2291_v20 = vpop.eup %2290  ;;  %v1408_v21 = vmul.f32 1.442695, %v1401_v19 }
 0x280   : > { %v1410_v22 = vsel %vm1201_vm2, %v2291_v20, 0.0 }
 0x281   : > { %2296 = vpow2.f32 %v1408_v21  ;;  %1411 = vadd.xlane.f32.xlu0 %v1410_v22 }
 0x283   : > { %v2293_v23 = vpop.eup %2292 }
 0x284   : > { %v1413_v24 = vsel %vm1201_vm2, %v2293_v23, 0.0 }
 0x285   : > { %1414 = vadd.xlane.f32.xlu1 %v1413_v24 }
 0x287   : > { %v2295_v25 = vpop.eup %2294 }
 0x288   : > { %v1416_v26 = vsel %vm1201_vm2, %v2295_v25, 0.0 }
 0x289   : > { %1417 = vadd.xlane.f32.xlu0 %v1416_v26 }
 0x28b   : > { %v2297_v27 = vpop.eup %2296 }
 0x28c   : > { %v1419_v28 = vsel %vm1201_vm2, %v2297_v27, 0.0 }
 0x28d   : > { %1420 = vadd.xlane.f32.xlu1 %v1419_v28 }
 0x30e   : > { %v1412_v29 = vpop.xlane.xlu0 %1411 }
 0x30f   : > { %2298 = vrcp.f32 %v1412_v29 }
 0x312   : > { %v1415_v30 = vpop.xlane.xlu1 %1414 }
 0x313   : > { %2300 = vrcp.f32 %v1415_v30 }
 0x316   : > { %v1418_v33 = vpop.xlane.xlu0 %1417 }
 0x317   : > { %2302 = vrcp.f32 %v1418_v33 }
 0x319   : > { %v2299_v35 = vpop.eup %2298 }
 0x31a   : > { %v1426_v38 = vmul.f32 %v2299_v35, %v2291_v20  ;;  %v1421_v39 = vpop.xlane.xlu1 %1420 }
 0x31b   : > { %2304 = vrcp.f32 %v1421_v39 }
 0x31c   : > { %v1430_v40 = vpack.c.bf16 %v1426_v38, %v1426_v38 }
 0x31d   : > { %v2301_v41 = vpop.eup %2300 }
 0x31e   : > { %v1427_v46 = vmul.f32 %v2301_v41, %v2293_v23  ;;  %2180 = vmatmul.mubr.msk.bf16.vlgmr.msra.gmra.mrb[32].mxu0 %vm1201_vm2, %v1430_v40 }
 0x31f   : > { %2190 = vmatpush3.bf16.msra.mxu0 %v1531_v42  ;;  %2191 = vmatprep.mubr.msk.bf16.mxu0 %vm2371_vm0, %v2370_v1 }
 0x320   : > { %v1431_v44 = vpack.c.bf16 %v1427_v46, %v1427_v46  ;;  %2201 = vmatprep.subr.bf16.mxu0 %v2370_v1 }
 0x321   : > { %v2303_v47 = vpop.eup %2302 }
 0x322   : > { %v1428_v49 = vmul.f32 %v2303_v47, %v2295_v25  ;;  %2186 = vmatmul.mubr.msk.bf16.vlgmr.msra.gmra.mrb[32].mxu1 %vm1201_vm2, %v1431_v44 }
 0x323   : > { %2196 = vmatpush3.bf16.msra.mxu1 %v1577_v48  ;;  %2197 = vmatprep.mubr.msk.bf16.mxu1 %vm2371_vm0, %v2370_v1 }
 0x324   : > { %v1432_v50 = vpack.c.bf16 %v1428_v49, %v1428_v49  ;;  %2207 = vmatprep.subr.bf16.mxu1 %v2370_v1 }
 0x325   : > { %v2305_v52 = vpop.eup %2304 }
 0x326   : > { %v1429_v53 = vmul.f32 %v2305_v52, %v2297_v27  ;;  %2192 = vmatmul.mubr.msk.bf16.vlgmr.msra.gmra.mrb[36].mxu0 %vm1201_vm2, %v1432_v50 }
 0x327   : > { %2202 = vmatpush3.bf16.msra.mxu0 %v1631_v51  ;;  %2203 = vmatprep.mubr.msk.bf16.mxu0 %vm2371_vm0, %v2370_v1 }
 0x328   : > { %v1433_v54 = vpack.c.bf16 %v1429_v53, %v1429_v53  ;;  %2213 = vmatprep.subr.bf16.mxu0 %v2370_v1 }
 0x32a   : > { %2198 = vmatmul.mubr.msk.bf16.vlgmr.msra.gmra.mrb[36].mxu1 %vm1201_vm2, %v1433_v54 }
 0x32b   : > { %2209 = vmatprep.mubr.msk.bf16.mxu1 %vm2371_vm0, %v2370_v1  ;;  %2208 = vmatpush3.bf16.msra.mxu1 %v1677_v56 }
 0x32c   : > { %2219 = vmatprep.subr.bf16.mxu1 %v2370_v1 }
 0x3f1   : > { %v1475_v58 = vpop.f32.mrb[32].mxu0 }
 0x3f2   : > { %v1619_v59 = vpack.c.bf16 %v1475_v58, %v1475_v58  ;;  %v2181_v60 = vpop.f32.mrb[33].mxu0 }
 0x3f3   : > { %v1478_v62 = vpop.f32.mrb[34].mxu0 }
 0x3f4   : > { %v2182_v0 = vpop.f32.mrb[35].mxu0  ;;  %2204 = vmatmul.mubr.msk.bf16.vlgmr.msra.gmra.mrb[40].mxu0 %vm1201_vm2, %v1619_v59 }
 0x3f5   : > { %v1521_v2 = vpop.f32.mrb[32].mxu1  ;;  %2214 = vmatpush3.bf16.msra.mxu0 %v1723_v61  ;;  %2215 = vmatprep.mubr.msk.bf16.mxu0 %vm2371_vm0, %v2370_v1 }
 0x3f6   : > { %v1620_v3 = vpack.c.bf16 %v1521_v2, %v1521_v2  ;;  %v2187_v4 = vpop.f32.mrb[33].mxu1 }
 0x3f7   : > { %v1524_v6 = vpop.f32.mrb[34].mxu1 }
 0x3f8   : > { %v2188_v7 = vpop.f32.mrb[35].mxu1  ;;  %2210 = vmatmul.mubr.msk.bf16.vlgmr.msra.gmra.mrb[40].mxu1 %vm1201_vm2, %v1620_v3 }
 0x3f9   : > { %v1567_v8 = vpop.f32.mrb[36].mxu0  ;;  %2220 = vmatpush3.bf16.msra.mxu1 %v1769_v5  ;;  %2221 = vmatprep.mubr.msk.bf16.mxu1 %vm2371_vm0, %v2370_v1 }
 0x3fa   : > { %v1621_v9 = vpack.c.bf16 %v1567_v8, %v1567_v8  ;;  %v2193_v10 = vpop.f32.mrb[37].mxu0 }
 0x3fb   : > { %v1570_v11 = vpop.f32.mrb[38].mxu0 }
 0x3fc   : > { %v2194_v12 = vpop.f32.mrb[39].mxu0  ;;  %2216 = vmatmul.mubr.msk.bf16.vlgmr.msra.gmra.mrb[44].mxu0 %vm1201_vm2, %v1621_v9 }
 0x3fd   : > { %v1613_v13 = vpop.f32.mrb[36].mxu1 }
 0x3fe   : > { %v1622_v14 = vpack.c.bf16 %v1613_v13, %v1613_v13  ;;  %v2199_v15 = vpop.f32.mrb[37].mxu1 }
 0x3ff   : > { %v1616_v16 = vpop.f32.mrb[38].mxu1 }
 0x400   : > { %v2200_v17 = vpop.f32.mrb[39].mxu1  ;;  %2222 = vmatmul.mubr.msk.bf16.vlgmr.msra.gmra.mrb[44].mxu1 %vm1201_vm2, %v1622_v14 }
 0x4c7   : > { %v1667_v18 = vpop.f32.mrb[40].mxu0 }
 0x4c8   : > { %v2205_v19 = vpop.f32.mrb[41].mxu0  ;;  %v1811_v1 = vsel %vm475_vm1, %v1667_v18, 0.0 }
 0x4c9   : > { %v1670_v20 = vpop.f32.mrb[42].mxu0 }
 0x4ca   : > { %v2206_v21 = vpop.f32.mrb[43].mxu0 }
 0x4cb   : > { %v1713_v22 = vpop.f32.mrb[40].mxu1 }
 0x4cc   : > { %v1812_v23 = vsel %vm475_vm1, %v1713_v22, 0.0  ;;  %v2211_v24 = vpop.f32.mrb[41].mxu1 }
 0x4cd   : > { %v1813_v25 = vadd.f32 %v1812_v23, %v1811_v1  ;;  %v1716_v26 = vpop.f32.mrb[42].mxu1 }
 0x4ce   : > { %v2212_v27 = vpop.f32.mrb[43].mxu1 }
 0x4cf   : > { %v1759_v28 = vpop.f32.mrb[44].mxu0 }
 0x4d0   : > { %v1814_v29 = vsel %vm475_vm1, %v1759_v28, 0.0  ;;  %v2217_v30 = vpop.f32.mrb[45].mxu0 }
 0x4d1   : > { %v1815_v31 = vadd.f32 %v1814_v29, %v1813_v25  ;;  %v1762_v32 = vpop.f32.mrb[46].mxu0 }
 0x4d2   : > { %v2218_v33 = vpop.f32.mrb[47].mxu0 }
 0x4d3   : > { %v1805_v34 = vpop.f32.mrb[44].mxu1 }
 0x4d4   : > { %v1816_v35 = vsel %vm475_vm1, %v1805_v34, 0.0  ;;  %v2223_v37 = vpop.f32.mrb[45].mxu1 }
 0x4d5   : > { %v1817_v38 = vadd.f32 %v1816_v35, %v1815_v31  ;;  %v1808_v39 = vpop.f32.mrb[46].mxu1 }
 0x4d6   : > { %v2224_v40 = vpop.f32.mrb[47].mxu1 }
 0x4d7   : > { %v1825_v41 = vadd.f32 %v1992_v36, %v1817_v38 }
 0x4d9   : > { %1826 = vst.msk [vmem:[%s403_s29] sm:$0xff] %vm475_vm1, %v1825_v41 }
 0x4da   : > { %2319 = shalt.err (!%p2316_p3)
}
 0x4db   : > { %s2320_s15 = scalar_lea.hbm %s2763_s14, 128  ;;  %s2324_s12 = scalar_lea.hbm %s2817_s11, 256 }
 0x4dc   : > { %p2321_p4 = scmp.ne.s32.totalorder %s2763_s14, %s2320_s15  ;;  %p2325_p9 = scmp.lt.u32.totalorder %s2763_s14, %s2817_s11 }
 0x4dd   : > { %p2326_p10 = scmp.lt.u32.totalorder %s2324_s12, %s2320_s15  ;;  %p2328_p12 = scmp.lt.u32.totalorder %s2320_s15, %s2763_s14 }
 0x4de   : > { %p2322_p7 = pnand %p2321_p4, %p2471_p5 }
 0x4df   : > { %p2327_p11 = por %p2326_p10, %p2325_p9 }
 0x4e0   : > { %p2323_p8 = pneg %p2322_p7 }
 0x4e1   : > { %p2329_p13 = por %p2328_p12, %p2327_p11 }
 0x4e3   : > { %p2330_p0 = pnand %p2329_p13, %p2323_p8 }
 0x4e5   : > { %2333 = shalt.err (!%p2330_p0)
}
 0x4e6   : > { %2225 = dma.vmem_to_hbm [thread:$0]  (%p2471_p5), %s2765_s30, 128, %s2763_s14, %s1828_s22  }
 0x4e7 PF: > { %p2231_p1 = scmp.ge.s32.totalorder %s2368_s20, 2  ;;  %s1853_s0 = sand.u32 1, %s2356_s17  }
 0x4e8   : > { %s1854_s21 = scalar_lea.sflag [#allocation3], %s1853_s0 }
 0x4e9   : > { %p2228_p2 = pnand %p2231_p1, %p2475_p6 }
 0x4eb   : > { %2351 = dma.done.wait (!%p2228_p2), %s1854_s21, 128  }
 0x4ec   : > { %2353 = vsyncadd (!%p2228_p2), %s1854_s21, 4294967168  ;;  %p21_p3 = scmp.ge.s32.totalorder %s2458_s23, 4   ;;  %s2822_s17 = smov %s2360_s18 }
 0x4ed   : > { %s2823_s18 = smov %s2364_s19  ;;  %s2824_s19 = smov %s2469_s26 }
 0x4ee   : > { %s2825_s20 = smov %s2458_s23  ;;  %23 = sbr.rel (!%p21_p3) target bundleno = 5 (0x5), region = 105 }
 0x4f5   :  { %1859 = vsyncpa [#allocation3], 1 }
 0x4f6   :  { %1861 = vsyncpa [#allocation3 + $0x1], 1 }

</bundles_post_ra>
